<compile_context>
chip_gen: v7x
topology: tpu7x:2x2x1
jax: 0.10.0
libtpu: 0.0.40
codegen_flags: <defaults>
</compile_context>

<pallas_src>
import functools

import jax
import jax.numpy as jnp
from jax.experimental import pallas as pl
from jax.experimental.pallas import tpu as pltpu

BN_EPS = 1e-5
H1, H2 = 128, 64


def _round_up(x, m):
    return ((x + m - 1) // m) * m


def _mlp_kernel(x_ref, w1_ref, b1_ref, w2_ref, b2_ref, w3_ref, b3_ref, o_ref):
    # Linear(input_dim, 128) + ReLU   (BN1 already folded into W2/b2)
    h = jnp.dot(x_ref[...], w1_ref[...], preferred_element_type=jnp.float32)
    h = jnp.maximum(h + b1_ref[...], 0.0)
    # Linear(128, 64) + ReLU          (BN2 already folded into W3/b3)
    h = jnp.dot(h, w2_ref[...], preferred_element_type=jnp.float32)
    h = jnp.maximum(h + b2_ref[...], 0.0)
    # Linear(64, out_dim)             (narrow masked store; negligible vs HBM win)
    o_ref[...] = (jnp.dot(h, w3_ref[...], preferred_element_type=jnp.float32)
                  + b3_ref[...]).astype(o_ref.dtype)


def _fold_params(p):
    """Fold BatchNorm (running stats + affine) into the following Linear."""
    a1 = p["g1"] * jax.lax.rsqrt(p["v1"] + BN_EPS)          # (1, H1)
    c1 = p["be1"] - p["m1"] * a1                             # (1, H1)
    a2 = p["g2"] * jax.lax.rsqrt(p["v2"] + BN_EPS)           # (1, H2)
    c2 = p["be2"] - p["m2"] * a2                             # (1, H2)

    w1, b1 = p["w1"], p["b1"]
    w2 = a1.reshape(-1, 1) * p["w2"]                         # (H1, H2)
    b2 = p["b2"] + c1 @ p["w2"]                              # (1, H2)
    w3 = a2.reshape(-1, 1) * p["w3"]                         # (H2, out)
    b3 = p["b3"] + c2 @ p["w3"]                              # (1, out)
    return w1, b1, w2, b2, w3, b3


@functools.partial(jax.jit, static_argnames=("tile_b",))
def improved_ann_forward(x, params, *, tile_b=2048):
    """Fused forward pass. x: (B, input_dim) f32 -> (B, output_dim) f32."""
    B, in_dim = x.shape
    out_dim = params["w3"].shape[1]

    w1, b1, w2, b2, w3, b3 = _fold_params(params)

    # Batch tile: multiple of 8 sublanes, capped by tile_b.  No batch padding:
    # grid = cdiv(B, tb); Pallas clips the ragged final block.
    tb = min(tile_b, _round_up(B, 8))
    # Keep >= 2 grid steps when batch allows, so the "parallel" batch axis can
    # be split across both TensorCores on v7x (no-op on single-TC v5e/v6e).
    if B > 8 and pl.cdiv(B, tb) < 2:
        tb = max(8, _round_up(pl.cdiv(B, 2), 8))
    grid = (pl.cdiv(B, tb),)

    resident = lambda shape: pl.BlockSpec(shape, lambda i: (0, 0))

    flops = 2 * B * (in_dim * H1 + H1 * H2 + H2 * out_dim)
    bytes_accessed = 4 * (B * in_dim + B * out_dim
                          + in_dim * H1 + H1 * H2 + H2 * out_dim
                          + H1 + H2 + out_dim)

    # Working-set estimate: double-buffered x/out tiles + intermediates +
    # resident params; raise the scoped VMEM limit (floor 32 MiB, cap well
    # under v7x's 64 MiB per-TC physical VMEM).
    vmem_est = 4 * (2 * tb * (in_dim + out_dim) + tb * (H1 + H2)
                    + 2 * (in_dim * H1 + H1 * H2 + H2 * out_dim
                           + H1 + H2 + out_dim))
    vmem_limit = int(min(max(2 * vmem_est, 32 << 20), 48 << 20))

    out = pl.pallas_call(
        _mlp_kernel,
        out_shape=jax.ShapeDtypeStruct((B, out_dim), jnp.float32),
        grid=grid,
        in_specs=[
            pl.BlockSpec((tb, in_dim), lambda i: (i, 0)),    # streamed x tile
            resident((in_dim, H1)), resident((1, H1)),
            resident((H1, H2)),     resident((1, H2)),
            resident((H2, out_dim)), resident((1, out_dim)),
        ],
        out_specs=pl.BlockSpec((tb, out_dim), lambda i: (i, 0)),
        compiler_params=pltpu.CompilerParams(
            dimension_semantics=("parallel",),
            vmem_limit_bytes=vmem_limit),
        cost_estimate=pl.CostEstimate(
            flops=flops, transcendentals=0, bytes_accessed=bytes_accessed),
    )(x, w1, b1, w2, b2, w3, b3)

    return out


def init_params(key, input_dim, output_dim):
    """Deterministic synthetic parameters matching the PyTorch module shapes."""
    ks = jax.random.split(key, 6)

    def lin(kw, kb, fan_in, fan_out):
        bound = 1.0 / jnp.sqrt(fan_in)
        w = jax.random.uniform(kw, (fan_in, fan_out), jnp.float32, -bound, bound)
        b = jax.random.uniform(kb, (1, fan_out), jnp.float32, -bound, bound)
        return w, b

    w1, b1 = lin(ks[0], ks[1], input_dim, H1)
    w2, b2 = lin(ks[2], ks[3], H1, H2)
    w3, b3 = lin(ks[4], ks[5], H2, output_dim)

    # Non-trivial BN stats/affine so the fold is actually exercised.
    kb1, kb2 = jax.random.split(ks[5])
    return {
        "w1": w1, "b1": b1,
        "g1": 1.0 + 0.1 * jax.random.normal(kb1, (1, H1), jnp.float32),
        "be1": 0.05 * jax.random.normal(kb2, (1, H1), jnp.float32),
        "m1": 0.1 * jax.random.normal(ks[0], (1, H1), jnp.float32),
        "v1": jnp.ones((1, H1), jnp.float32) + 0.2,
        "w2": w2, "b2": b2,
        "g2": 1.0 + 0.1 * jax.random.normal(ks[1], (1, H2), jnp.float32),
        "be2": 0.05 * jax.random.normal(ks[2], (1, H2), jnp.float32),
        "m2": 0.1 * jax.random.normal(ks[3], (1, H2), jnp.float32),
        "v2": jnp.ones((1, H2), jnp.float32) + 0.3,
        "w3": w3, "b3": b3,
    }


def _reference(x, p):
    h = x @ p["w1"] + p["b1"]
    h = jnp.maximum(h, 0.0)
    h = (h - p["m1"]) / jnp.sqrt(p["v1"] + BN_EPS) * p["g1"] + p["be1"]
    h = h @ p["w2"] + p["b2"]
    h = jnp.maximum(h, 0.0)
    h = (h - p["m2"]) / jnp.sqrt(p["v2"] + BN_EPS) * p["g2"] + p["be2"]
    return h @ p["w3"] + p["b3"]


if __name__ == "__main__":
    key = jax.random.PRNGKey(0)
    k_param, k_x = jax.random.split(key)

    B, input_dim, output_dim = 8, 16, 8
    params = init_params(k_param, input_dim, output_dim)
    x = jax.random.normal(k_x, (B, input_dim), jnp.float32)

    out = jax.block_until_ready(improved_ann_forward(x, params))
    ref = _reference(x, params)
    assert out.shape == (B, output_dim)
    assert jnp.allclose(out, ref, atol=1e-4, rtol=1e-4), float(
        jnp.max(jnp.abs(out - ref)))

    # Multi-step grid with a ragged final block (B not a multiple of the tile).
    B2 = 1030
    x2 = jax.random.normal(k_x, (B2, input_dim), jnp.float32)
    out2 = jax.block_until_ready(improved_ann_forward(x2, params))
    ref2 = _reference(x2, params)
    assert out2.shape == (B2, output_dim)
    assert jnp.allclose(out2, ref2, atol=1e-4, rtol=1e-4), float(
        jnp.max(jnp.abs(out2 - ref2)))

    # Small tile sweep path (forces several grid steps).
    out3 = jax.block_until_ready(improved_ann_forward(x2, params, tile_b=256))
    assert jnp.allclose(out3, ref2, atol=1e-4, rtol=1e-4), float(
        jnp.max(jnp.abs(out3 - ref2)))

    print("KERNEL_OK")
</pallas_src>

<mosaic_0001>
module attributes {stable_mosaic.version = 11 : i64} {
  func.func @_mlp_kernel(%arg0: i32, %arg1: memref<8x16xf32, #tpu.memory_space<vmem>>, %arg2: memref<16x128xf32, #tpu.memory_space<vmem>>, %arg3: memref<1x128xf32, #tpu.memory_space<vmem>>, %arg4: memref<128x64xf32, #tpu.memory_space<vmem>>, %arg5: memref<1x64xf32, #tpu.memory_space<vmem>>, %arg6: memref<64x8xf32, #tpu.memory_space<vmem>>, %arg7: memref<1x8xf32, #tpu.memory_space<vmem>>, %arg8: memref<8x8xf32, #tpu.memory_space<vmem>>) attributes {dimension_semantics = [#tpu.dimension_semantics<parallel>], iteration_bounds = array<i64: 1>, scalar_prefetch = 0 : i64, scratch_operands = 0 : i64, tpu.core_type = #tpu.core_type<tc>, window_params = [{transform_indices = @transform_0, window_bounds = array<i64: 8, 16>}, {pipeline_mode = #tpu.pipeline_mode<synchronous>, transform_indices = @transform_1, window_bounds = array<i64: 16, 128>}, {pipeline_mode = #tpu.pipeline_mode<synchronous>, transform_indices = @transform_2, window_bounds = array<i64: 1, 128>}, {pipeline_mode = #tpu.pipeline_mode<synchronous>, transform_indices = @transform_3, window_bounds = array<i64: 128, 64>}, {pipeline_mode = #tpu.pipeline_mode<synchronous>, transform_indices = @transform_4, window_bounds = array<i64: 1, 64>}, {pipeline_mode = #tpu.pipeline_mode<synchronous>, transform_indices = @transform_5, window_bounds = array<i64: 64, 8>}, {pipeline_mode = #tpu.pipeline_mode<synchronous>, transform_indices = @transform_6, window_bounds = array<i64: 1, 8>}, {transform_indices = @transform_7, window_bounds = array<i64: 8, 8>}]} {
    %c0 = arith.constant 0 : index
    %c0_0 = arith.constant 0 : index
    %0 = vector.load %arg1[%c0, %c0_0] : memref<8x16xf32, #tpu.memory_space<vmem>>, vector<8x16xf32>
    %c0_1 = arith.constant 0 : index
    %c0_2 = arith.constant 0 : index
    %1 = vector.load %arg2[%c0_1, %c0_2] : memref<16x128xf32, #tpu.memory_space<vmem>>, vector<16x128xf32>
    %cst = arith.constant dense<0.000000e+00> : vector<8x128xf32>
    %2 = tpu.matmul %0, %1, %cst {dimension_numbers = #tpu.dot_dimension_numbers<[1], [0], [0], [1], [0, 0, 1, 1], [], []>} : vector<8x16xf32>, vector<16x128xf32>, vector<8x128xf32> -> vector<8x128xf32>
    %c0_3 = arith.constant 0 : index
    %c0_4 = arith.constant 0 : index
    %3 = vector.load %arg3[%c0_3, %c0_4] : memref<1x128xf32, #tpu.memory_space<vmem>>, vector<1x128xf32>
    %4 = vector.broadcast %3 : vector<1x128xf32> to vector<8x128xf32>
    %5 = arith.addf %2, %4 : vector<8x128xf32>
    %cst_5 = arith.constant 0.000000e+00 : f32
    %6 = vector.broadcast %cst_5 : f32 to vector<8x128xf32>
    %7 = arith.maximumf %5, %6 : vector<8x128xf32>
    %c0_6 = arith.constant 0 : index
    %c0_7 = arith.constant 0 : index
    %8 = vector.load %arg4[%c0_6, %c0_7] : memref<128x64xf32, #tpu.memory_space<vmem>>, vector<128x64xf32>
    %cst_8 = arith.constant dense<0.000000e+00> : vector<8x64xf32>
    %9 = tpu.matmul %7, %8, %cst_8 {dimension_numbers = #tpu.dot_dimension_numbers<[1], [0], [0], [1], [0, 0, 1, 1], [], []>} : vector<8x128xf32>, vector<128x64xf32>, vector<8x64xf32> -> vector<8x64xf32>
    %c0_9 = arith.constant 0 : index
    %c0_10 = arith.constant 0 : index
    %10 = vector.load %arg5[%c0_9, %c0_10] : memref<1x64xf32, #tpu.memory_space<vmem>>, vector<1x64xf32>
    %11 = vector.broadcast %10 : vector<1x64xf32> to vector<8x64xf32>
    %12 = arith.addf %9, %11 : vector<8x64xf32>
    %cst_11 = arith.constant 0.000000e+00 : f32
    %13 = vector.broadcast %cst_11 : f32 to vector<8x64xf32>
    %14 = arith.maximumf %12, %13 : vector<8x64xf32>
    %c0_12 = arith.constant 0 : index
    %c0_13 = arith.constant 0 : index
    %15 = vector.load %arg6[%c0_12, %c0_13] : memref<64x8xf32, #tpu.memory_space<vmem>>, vector<64x8xf32>
    %cst_14 = arith.constant dense<0.000000e+00> : vector<8x8xf32>
    %16 = tpu.matmul %14, %15, %cst_14 {dimension_numbers = #tpu.dot_dimension_numbers<[1], [0], [0], [1], [0, 0, 1, 1], [], []>} : vector<8x64xf32>, vector<64x8xf32>, vector<8x8xf32> -> vector<8x8xf32>
    %c0_15 = arith.constant 0 : index
    %c0_16 = arith.constant 0 : index
    %17 = vector.load %arg7[%c0_15, %c0_16] : memref<1x8xf32, #tpu.memory_space<vmem>>, vector<1x8xf32>
    %18 = vector.broadcast %17 : vector<1x8xf32> to vector<8x8xf32>
    %19 = arith.addf %16, %18 : vector<8x8xf32>
    %c0_17 = arith.constant 0 : index
    %c0_18 = arith.constant 0 : index
    %20 = vector.load %arg8[%c0_17, %c0_18] : memref<8x8xf32, #tpu.memory_space<vmem>>, vector<8x8xf32>
    tpu.vector_store %arg8[%c0_17, %c0_18], %19 {strides = array<i32>} : memref<8x8xf32, #tpu.memory_space<vmem>>, vector<8x8xf32>,
    return
  }
  func.func @transform_0(%arg0: i32) -> (i32, i32) {
    %c0_i32 = arith.constant 0 : i32
    %c0_i32_0 = arith.constant 0 : i32
    return %arg0, %c0_i32 : i32, i32
  }
  func.func @transform_1(%arg0: i32) -> (i32, i32) {
    %c0_i32 = arith.constant 0 : i32
    %c0_i32_0 = arith.constant 0 : i32
    %c0_i32_1 = arith.constant 0 : i32
    return %c0_i32, %c0_i32_0 : i32, i32
  }
  func.func @transform_2(%arg0: i32) -> (i32, i32) {
    %c0_i32 = arith.constant 0 : i32
    %c0_i32_0 = arith.constant 0 : i32
    %c0_i32_1 = arith.constant 0 : i32
    return %c0_i32, %c0_i32_0 : i32, i32
  }
  func.func @transform_3(%arg0: i32) -> (i32, i32) {
    %c0_i32 = arith.constant 0 : i32
    %c0_i32_0 = arith.constant 0 : i32
    %c0_i32_1 = arith.constant 0 : i32
    return %c0_i32, %c0_i32_0 : i32, i32
  }
  func.func @transform_4(%arg0: i32) -> (i32, i32) {
    %c0_i32 = arith.constant 0 : i32
    %c0_i32_0 = arith.constant 0 : i32
    %c0_i32_1 = arith.constant 0 : i32
    return %c0_i32, %c0_i32_0 : i32, i32
  }
  func.func @transform_5(%arg0: i32) -> (i32, i32) {
    %c0_i32 = arith.constant 0 : i32
    %c0_i32_0 = arith.constant 0 : i32
    %c0_i32_1 = arith.constant 0 : i32
    return %c0_i32, %c0_i32_0 : i32, i32
  }
  func.func @transform_6(%arg0: i32) -> (i32, i32) {
    %c0_i32 = arith.constant 0 : i32
    %c0_i32_0 = arith.constant 0 : i32
    %c0_i32_1 = arith.constant 0 : i32
    return %c0_i32, %c0_i32_0 : i32, i32
  }
  func.func @transform_7(%arg0: i32) -> (i32, i32) {
    %c0_i32 = arith.constant 0 : i32
    %c0_i32_0 = arith.constant 0 : i32
    return %arg0, %c0_i32 : i32, i32
  }
}

</mosaic_0001>

<bundles_post_ra>
// kernel: improved_ann_forward.1
= control target key start
LH: loop header
LB: loop body
LE: loop exit
PB: predicated region body
PF: predicated region fallthrough
CT: control target
= control target key end

     0   :  { %v473_v2 = vmov 0.0|0.0   ;;  %vm474_vm0 = vmmov 0   ;;  %v475_v4 = vmov 0.0   ;;  %vm37_vm1 = vcmask 130048   ;;  %s635_s0 = inlined_call_operand.vmem [shape: f32[8,16], index: 0, kind: input, shape index: {}]   ;;  %s636_s1 = inlined_call_operand.vmem [shape: f32[16,128], index: 1, kind: input, shape index: {}]   ;;  %s637_s2 = inlined_call_operand.vmem [shape: f32[1,128], index: 2, kind: input, shape index: {}]   ;;  %s638_s3 = inlined_call_operand.vmem [shape: f32[128,64], index: 3, kind: input, shape index: {}]   ;;  %s639_s4 = inlined_call_operand.vmem [shape: f32[1,64], index: 4, kind: input, shape index: {}]   ;;  %s640_s5 = inlined_call_operand.vmem [shape: f32[64,8], index: 5, kind: input, shape index: {}]   ;;  %s641_s6 = inlined_call_operand.vmem [shape: f32[1,8], index: 6, kind: input, shape index: {}]   ;;  %s642_s7 = inlined_call_operand.hbm [shape: f32[8,8], index: 7, kind: output, shape index: {}]  }
   0x1   :  { %v28_v0 = vld [vmem:[%s636_s1] sm:$0xff]  ;;  %v29_v1 = vld [vmem:[%s636_s1 + $0x8] sm:$0xff]  ;;  %406 = vmatprep.subr.bf16.mxu0 %v473_v2  ;;  %349 = vmatprep.mubr.msk.f32.mxu0 %vm474_vm0, %v475_v4  ;;  %v114_v7 = vld [vmem:[%s638_s3 + $0x10] sm:$0xff] }
   0x2   :  { %v407_v3 = vpack.c.bf16 %v29_v1, %v28_v0  ;;  %v112_v5 = vld [vmem:[%s638_s3] sm:$0xff]  ;;  %v113_v6 = vld [vmem:[%s638_s3 + $0x8] sm:$0xff]  ;;  %409 = vmatprep.subr.bf16.mxu1 %v473_v2  ;;  %v115_v9 = vld [vmem:[%s638_s3 + $0x18] sm:$0xff]  ;;  %384 = vmatprep.mubr.msk.f32.mxu1 %vm474_vm0, %v475_v4 }
   0x3   :  { %v410_v8 = vpack.c.bf16 %v113_v6, %v112_v5  ;;  %v27_v10 = vld [vmem:[%s635_s0] sm:$0xff]  ;;  %v413_v11 = vpack.c.bf16 %v115_v9, %v114_v7  ;;  %v117_v13 = vld [vmem:[%s638_s3 + $0x28] sm:$0xff] }
   0x4   :  { %408 = vmatpush3.bf16.msra.mxu0 %v407_v3  ;;  %v116_v12 = vld [vmem:[%s638_s3 + $0x20] sm:$0xff] }
   0x5   :  { %411 = vmatpush3.bf16.msra.mxu1 %v410_v8  ;;  %433 = vmatprep.subr.bf16.mxu0 %v473_v2 }
   0x6   :  { %412 = vmatprep.subr.bf16.mxu1 %v473_v2 }
   0x7   :  { %350 = vmatmul.mubr.msk.f32.vlgmr.msra.gmra.mrb[0].mxu0 %vm37_vm1, %v27_v10 }
   0x8   :  { %12 = vsyncpa [#allocation3], 0  ;;  %403 = vmatprep.mubr.msk.f32.mxu0 %vm474_vm0, %v475_v4  ;;  %v416_v14 = vpack.c.bf16 %v117_v13, %v116_v12  ;;  %v118_v15 = vld [vmem:[%s638_s3 + $0x30] sm:$0xff]  ;;  %v119_v16 = vld [vmem:[%s638_s3 + $0x38] sm:$0xff]  ;;  %vm221_vm2 = vcmask 523264   ;;  %s476_s9 = smov [#allocation2]  }
   0x9   :  { %414 = vmatpush3.bf16.msra.mxu1 %v413_v11  ;;  %v419_v17 = vpack.c.bf16 %v119_v16, %v118_v15  ;;  %v120_v18 = vld [vmem:[%s638_s3 + $0x40] sm:$0xff]  ;;  %v121_v19 = vld [vmem:[%s638_s3 + $0x48] sm:$0xff]  ;;  %v122_v21 = vld [vmem:[%s638_s3 + $0x50] sm:$0xff]  ;;  %s303_s10 = sshll.u32 %s476_s9, 4  ;;  %vm295_vm3 = vcmask 64512   ;;  %s304_s10 = int_to_ptr.vmem [resolvable:$true] %s303_s10 }
   0xa   :  { %415 = vmatprep.subr.bf16.mxu1 %v473_v2  ;;  %v422_v20 = vpack.c.bf16 %v121_v19, %v120_v18  ;;  %v123_v22 = vld [vmem:[%s638_s3 + $0x58] sm:$0xff]  ;;  %v124_v24 = vld [vmem:[%s638_s3 + $0x60] sm:$0xff]  ;;  %v125_v25 = vld [vmem:[%s638_s3 + $0x68] sm:$0xff]  ;;  %p454_p1 = scmp.lt.s32.totalorder %s304_s10, %s304_s10 }
   0xb   :  { %v425_v23 = vpack.c.bf16 %v123_v22, %v122_v21  ;;  %v428_v26 = vpack.c.bf16 %v125_v25, %v124_v24  ;;  %v126_v27 = vld [vmem:[%s638_s3 + $0x70] sm:$0xff]  ;;  %v127_v28 = vld [vmem:[%s638_s3 + $0x78] sm:$0xff]  ;;  %v206_v30 = vld [vmem:[%s640_s5] sm:$0xff] }
   0xc   :  { %v431_v29 = vpack.c.bf16 %v127_v28, %v126_v27  ;;  %v207_v31 = vld [vmem:[%s640_s5 + $0x8] sm:$0xff]  ;;  %v208_v32 = vld [vmem:[%s640_s5 + $0x10] sm:$0xff]  ;;  %v209_v34 = vld [vmem:[%s640_s5 + $0x18] sm:$0xff] }
   0xd   :  { %417 = vmatpush3.bf16.msra.mxu1 %v416_v14  ;;  %v434_v33 = vpack.c.bf16 %v207_v31, %v206_v30  ;;  %v437_v35 = vpack.c.bf16 %v209_v34, %v208_v32  ;;  %v210_v36 = vld [vmem:[%s640_s5 + $0x20] sm:$0xff]  ;;  %v211_v37 = vld [vmem:[%s640_s5 + $0x28] sm:$0xff]  ;;  %v212_v44 = vld [vmem:[%s640_s5 + $0x30] sm:$0xff] }
   0xe   :  { %418 = vmatprep.subr.bf16.mxu1 %v473_v2  ;;  %v440_v38 = vpack.c.bf16 %v211_v37, %v210_v36  ;;  %v311_v39 = vld [vmem:[%s637_s2] ss:$0 sm:$0xff]  ;;  %v213_v45 = vld [vmem:[%s640_s5 + $0x38] sm:$0xff]  ;;  %s449_s5 = scalar_lea.vmem %s304_s10, 128 }
   0xf   :  { %435 = vmatpush3.bf16.msra.mxu0 %v434_v33  ;;  %v443_v46 = vpack.c.bf16 %v213_v45, %v212_v44  ;;  %v313_v47 = vld [vmem:[%s639_s4] ss:$0 sm:$0xff]  ;;  %p450_p0 = scmp.ne.s32.totalorder %s304_s10, %s449_s5  ;;  %p455_p2 = scmp.lt.s32.totalorder %s449_s5, %s449_s5 }
  0x10   :  { %436 = vmatprep.subr.bf16.mxu0 %v473_v2  ;;  %v314_v52 = vld [vmem:[%s641_s6] ss:$0 sm:$0xff] }
  0x11   :  { %420 = vmatpush3.bf16.msra.mxu1 %v419_v17  ;;  %p456_p3 = por %p455_p2, %p454_p1 }
  0x12   :  { %421 = vmatprep.subr.bf16.mxu1 %v473_v2 }
  0x13   :  { %438 = vmatpush3.bf16.msra.mxu0 %v437_v35  ;;  %p457_p4 = pnand %p456_p3, %p450_p0 }
  0x14   :  { %439 = vmatprep.subr.bf16.mxu0 %v473_v2 }
  0x15   :  { %423 = vmatpush3.bf16.msra.mxu1 %v422_v20 }
  0x16   :  { %424 = vmatprep.subr.bf16.mxu1 %v473_v2 }
  0x17   :  { %441 = vmatpush3.bf16.msra.mxu0 %v440_v38 }
  0x18   :  { %442 = vmatprep.subr.bf16.mxu0 %v473_v2 }
  0x19   :  { %426 = vmatpush3.bf16.msra.mxu1 %v425_v23 }
  0x1a   :  { %427 = vmatprep.subr.bf16.mxu1 %v473_v2 }
  0x1b   :  { %444 = vmatpush3.bf16.msra.mxu0 %v443_v46 }
  0x1d   :  { %429 = vmatpush3.bf16.msra.mxu1 %v428_v26 }
  0x1e   :  { %430 = vmatprep.subr.bf16.mxu1 %v473_v2 }
  0x21   :  { %432 = vmatpush3.bf16.msra.mxu1 %v431_v29 }
  0xda   :  { %v107_v40 = vpop.f32.mrb[0].mxu0 }
  0xdb   :  { %v108_v41 = vadd.f32 %v311_v39, %v107_v40  ;;  %v351_v42 = vpop.f32.mrb[1].mxu0 }
  0xdd   :  { %v111_v43 = vmax.f32 %v108_v41, 0.0 }
  0xdf   :  { %385 = vmatmul.mubr.f32.vlgmr.msra.gmra.mrb[0].mxu1 %v111_v43 }
 0x1b2   :  { %v201_v48 = vpop.f32.mrb[0].mxu1 }
 0x1b3   :  { %v202_v49 = vadd.f32 %v313_v47, %v201_v48  ;;  %v386_v50 = vpop.f32.mrb[1].mxu1 }
 0x1b5   :  { %v205_v51 = vmax.f32 %v202_v49, 0.0 }
 0x1b7   :  { %404 = vmatmul.mubr.msk.f32.vlgmr.msra.gmra.mrb[2].mxu0 %vm221_vm2, %v205_v51 }
 0x28a   :  { %v291_v53 = vpop.f32.mrb[2].mxu0 }
 0x28b   :  { %v292_v54 = vadd.f32 %v314_v52, %v291_v53  ;;  %v405_v55 = vpop.f32.mrb[3].mxu0 }
 0x28d   :  { %296 = vst.msk [vmem:[#allocation2] sm:$0xff] %vm295_vm3, %v292_v54 }
 0x28e   :  { %460 = shalt.err (!%p457_p4)
}
 0x28f   :  { %s461_s11 = scalar_lea.hbm %s642_s7, 128 }
 0x290   :  { %p462_p5 = scmp.ne.s32.totalorder %s642_s7, %s461_s11  ;;  %p465_p6 = scmp.lt.u32.totalorder %s461_s11, %s642_s7 }
 0x292   :  { %p467_p7 = pnand %p465_p6, %p462_p5 }
 0x294   :  { %470 = shalt.err (!%p467_p7)
}
 0x295   :  { %306 = dma.vmem_to_hbm [thread:$0]  %s304_s10, 128, %s642_s7, [#allocation3]  }
 0x296   :  { %471 = dma.done.wait [#allocation3], 128  }
 0x297   :  { %472 = vsyncadd [#allocation3], 4294967168 }
 0x298   :  { %310 = vsyncpa [#allocation3], 1 }

</bundles_post_ra>
